<compile_context>
chip_gen: v5e
topology: v5e:2x2
jax: 0.10.0
libtpu: 0.0.40
codegen_flags: <defaults>
</compile_context>

<pallas_src>
import functools
import math

import numpy as np

import jax
import jax.numpy as jnp
from jax.experimental import pallas as pl
from jax.experimental.pallas import tpu as pltpu


# --------------------------------------------------------------------------
# generation-aware VMEM / tiling budgets
# --------------------------------------------------------------------------
def _tpu_vmem_capacity_bytes():
    try:
        info = pltpu.get_tpu_info()
        cap = getattr(info, "vmem_capacity_bytes", None)
        if cap:
            return int(cap)
    except Exception:
        pass
    return 64 * 1024 * 1024            # conservative default (v7x per-core VMEM)


_VMEM_CAP = _tpu_vmem_capacity_bytes()
_LARGE_VMEM = _VMEM_CAP >= 96 * 1024 * 1024            # 128 MiB parts (v5e / v6e)
_VMEM_LIMIT = min((_VMEM_CAP * 3) // 4, 100 * 1024 * 1024)   # 96 MiB v5e/v6e, 48 MiB v7x
_ROW_TILE_BYTES = (4 if _LARGE_VMEM else 2) * 1024 * 1024
_ROW_CAP = 1024 if _LARGE_VMEM else 512
_FUSED_MAX_BH = 64         # unroll bound for the in-kernel head/batch merge loop


def _mosaic_params(n_parallel_axes=1):
    return pltpu.CompilerParams(
        dimension_semantics=("parallel",) * n_parallel_axes,
        vmem_limit_bytes=_VMEM_LIMIT)


# --------------------------------------------------------------------------
# tiling helpers
# --------------------------------------------------------------------------
def _largest_divisor_tile(n, target, mult=8):
    """Largest t <= target with n % t == 0 and t % mult == 0 (falls back to n)."""
    if n <= target:
        return n
    for t in range(min(target, n), 0, -1):
        if n % t == 0 and t % mult == 0:
            return t
    return n


def _row_tile(n_rows, row_bytes):
    target = max(8, min(_ROW_CAP, _ROW_TILE_BYTES // max(1, row_bytes)))
    if n_rows > 8:
        # prefer >= 2 grid steps: keeps both v7x TensorCores busy, and the
        # ~0.35us/step overhead is negligible on single-core parts.
        target = min(target, max(8, n_rows // 2))
    return _largest_divisor_tile(n_rows, target, 8)


def _pick_bh_tile(bh, lq, lk, dk, dv, attn_bytes, mask_rows):
    """(head*batch) slices per fallback-SDPA grid step, sized from real VMEM use."""
    per = 2 * (lq * dk + lk * dk + lk * dv) * 2        # q/k/v slices, bf16, double-buffered
    per += 3 * lq * lk * 4                             # scores / exp / probs temporaries
    per += 2 * lq * dv * 2                             # output slice (bf16, double-buffered)
    per += 2 * lq * lk * attn_bytes                    # attention-prob output slice
    if mask_rows > 1:
        per += 2 * lq * lk * 4                         # per-slice mask
    budget = int(_VMEM_LIMIT * 0.7)
    if mask_rows == 1:
        budget -= 2 * lq * lk * 4                      # shared mask block
    t = max(1, min(bh, budget // max(1, per)))
    if bh > 1:
        t = min(t, max(1, bh // 2))                    # >= 2 grid steps when possible
    while bh % t:
        t -= 1
    return t


def _fused_vmem_bytes(bh, tq, lk, dk, dv, sz_b, dm, n_head,
                      mask_rows, attn_bytes, out_bytes):
    byt = 2 * bh * lk * (dk + dv) * 2          # resident K and V blocks (bf16)
    byt += 2 * bh * tq * dk * 2                # Q time-tile
    byt += 2 * mask_rows * tq * lk * 4         # additive-mask tile
    byt += 3 * bh * tq * lk * 4                # scores / exp / probs temporaries
    byt += 2 * bh * tq * lk * attn_bytes       # attention-prob output block
    byt += bh * tq * dv * 4                    # attn @ V result
    byt += 2 * n_head * dv * dm * 2            # W_fc block
    byt += 2 * tq * sz_b * dm * 4              # residual block
    byt += 2 * tq * sz_b * dm * out_bytes      # output block
    byt += 2 * tq * sz_b * dm * 4              # fc / LayerNorm temporaries
    return byt


def _pick_fused_tq(bh, lq, lk, dk, dv, sz_b, dm, n_head,
                   mask_rows, attn_bytes, out_bytes):
    """Query-time tile for the fused path, or None if the fused path is unsuitable."""
    if bh > _FUSED_MAX_BH:
        return None
    budget = int(_VMEM_LIMIT * 0.8)
    cands = [t for t in range(lq, 0, -1)
             if lq % t == 0 and (t % 8 == 0 or t == lq)]
    multi = [t for t in cands if lq // t >= 2]         # >= 2 grid steps preferred (v7x)
    for t in multi + [t for t in cands if t not in multi]:
        if _fused_vmem_bytes(bh, t, lk, dk, dv, sz_b, dm, n_head,
                             mask_rows, attn_bytes, out_bytes) <= budget:
            return t
    return None


# --------------------------------------------------------------------------
# Kernel 1a: self-attention Q/K/V projection (x read once, 3 outputs emitted)
# --------------------------------------------------------------------------
def _self_qkv_kernel(x_ref, wq_ref, wk_ref, wv_ref, qo_ref, ko_ref, vo_ref,
                     *, compute_dtype):
    x = x_ref[...].astype(compute_dtype)
    qo_ref[...] = jnp.dot(x, wq_ref[...],
                          preferred_element_type=jnp.float32).astype(qo_ref.dtype)
    ko_ref[...] = jnp.dot(x, wk_ref[...],
                          preferred_element_type=jnp.float32).astype(ko_ref.dtype)
    vo_ref[...] = jnp.dot(x, wv_ref[...],
                          preferred_element_type=jnp.float32).astype(vo_ref.dtype)


def self_qkv_projection(x, wq_t, wk_t, wv_t, compute_dtype=jnp.bfloat16):
    n, d_model = x.shape
    dq, dk_, dv_ = wq_t.shape[1], wk_t.shape[1], wv_t.shape[1]
    tn = _row_tile(n, (d_model + dq + dk_ + dv_) * 4)
    row_spec = lambda d: pl.BlockSpec((tn, d), lambda i: (i, 0))
    full_spec = lambda a: pl.BlockSpec(a.shape, lambda i: (0, 0))
    return pl.pallas_call(
        functools.partial(_self_qkv_kernel, compute_dtype=compute_dtype),
        out_shape=(jax.ShapeDtypeStruct((n, dq), compute_dtype),
                   jax.ShapeDtypeStruct((n, dk_), compute_dtype),
                   jax.ShapeDtypeStruct((n, dv_), compute_dtype)),
        grid=(n // tn,),
        in_specs=[row_spec(d_model), full_spec(wq_t), full_spec(wk_t), full_spec(wv_t)],
        out_specs=(row_spec(dq), row_spec(dk_), row_spec(dv_)),
        compiler_params=_mosaic_params(1),
    )(x, wq_t, wk_t, wv_t)


# --------------------------------------------------------------------------
# Kernel 1b: fused 3-input Q/K/V projection (cross-attention, equal lengths)
# --------------------------------------------------------------------------
def _qkv_proj_kernel(xq_ref, xk_ref, xv_ref, wq_ref, wk_ref, wv_ref,
                     qo_ref, ko_ref, vo_ref, *, compute_dtype):
    def proj(x_ref, w_ref, o_ref):
        x = x_ref[...].astype(compute_dtype)
        o_ref[...] = jnp.dot(x, w_ref[...],
                             preferred_element_type=jnp.float32).astype(o_ref.dtype)
    proj(xq_ref, wq_ref, qo_ref)
    proj(xk_ref, wk_ref, ko_ref)
    proj(xv_ref, wv_ref, vo_ref)


def qkv_projection(xq, xk, xv, wq_t, wk_t, wv_t, compute_dtype=jnp.bfloat16):
    n, d_model = xq.shape
    dq, dk_, dv_ = wq_t.shape[1], wk_t.shape[1], wv_t.shape[1]
    tn = _row_tile(n, d_model * 4 * 2)
    row_spec = lambda d: pl.BlockSpec((tn, d), lambda i: (i, 0))
    full_spec = lambda a: pl.BlockSpec(a.shape, lambda i: (0, 0))
    return pl.pallas_call(
        functools.partial(_qkv_proj_kernel, compute_dtype=compute_dtype),
        out_shape=(jax.ShapeDtypeStruct((n, dq), compute_dtype),
                   jax.ShapeDtypeStruct((n, dk_), compute_dtype),
                   jax.ShapeDtypeStruct((n, dv_), compute_dtype)),
        grid=(n // tn,),
        in_specs=[row_spec(d_model), row_spec(d_model), row_spec(d_model),
                  full_spec(wq_t), full_spec(wk_t), full_spec(wv_t)],
        out_specs=(row_spec(dq), row_spec(dk_), row_spec(dv_)),
        compiler_params=_mosaic_params(1),
    )(xq, xk, xv, wq_t, wk_t, wv_t)


# --------------------------------------------------------------------------
# Kernel 1c: generic bias-free linear, row + column tiled (different lengths)
# --------------------------------------------------------------------------
def _linear_kernel(x_ref, w_ref, o_ref, *, compute_dtype):
    x = x_ref[...].astype(compute_dtype)
    o_ref[...] = jnp.dot(x, w_ref[...],
                         preferred_element_type=jnp.float32).astype(o_ref.dtype)


def linear_nobias(x, w_t, out_dtype, compute_dtype=jnp.bfloat16):
    n, d_in = x.shape
    d_out = w_t.shape[1]
    # column-tile the weight when it cannot comfortably sit in VMEM
    tc_target = max(128, (8 * 1024 * 1024) // max(1, d_in * 2))
    tc = d_out if d_out <= tc_target else _largest_divisor_tile(d_out, tc_target, 128)
    tn = _row_tile(n, (d_in + tc) * 4)
    return pl.pallas_call(
        functools.partial(_linear_kernel, compute_dtype=compute_dtype),
        out_shape=jax.ShapeDtypeStruct((n, d_out), out_dtype),
        grid=(n // tn, d_out // tc),
        in_specs=[pl.BlockSpec((tn, d_in), lambda i, j: (i, 0)),
                  pl.BlockSpec((d_in, tc), lambda i, j: (0, j))],
        out_specs=pl.BlockSpec((tn, tc), lambda i, j: (i, j)),
        compiler_params=_mosaic_params(2),
    )(x, w_t)


# --------------------------------------------------------------------------
# Kernel 2 (fused path): attention + output projection + residual + LayerNorm
#   grid over query-time tiles; K/V resident in VMEM; head merge done in-kernel
#   against per-head (d_v, d_model) slices of W_fc -> lane-dense output.
# --------------------------------------------------------------------------
def _attn_fc_ln_kernel(*refs, n_head, d_v, eps, compute_dtype, has_mask, return_attn):
    q_ref, k_ref, v_ref = refs[:3]
    pos = 3
    m_ref = None
    if has_mask:
        m_ref = refs[pos]
        pos += 1
    res_ref, wfc_ref, g_ref, b_ref = refs[pos:pos + 4]
    pos += 4
    o_ref = refs[pos]
    attn_ref = refs[pos + 1] if return_attn else None

    # scale 1/sqrt(d_k) is already folded into W_q, so q arrives pre-scaled
    q = q_ref[...]                                   # (BH, tq, dk)  bf16
    k = k_ref[...]                                   # (BH, Lk, dk)  bf16
    v = v_ref[...]                                   # (BH, Lk, dv)  bf16
    s = jax.lax.dot_general(q, k, (((2,), (2,)), ((0,), (0,))),
                            preferred_element_type=jnp.float32)
    if has_mask:
        s = s + m_ref[...]                           # (1|BH, tq, Lk) broadcasts
    s_max = jnp.max(s, axis=-1, keepdims=True)
    p = jnp.exp(s - s_max)
    denom = jnp.sum(p, axis=-1, keepdims=True)
    attn = p * pl.reciprocal(denom)                  # exact reciprocal (rows sum to 1)
    if attn_ref is not None:
        attn_ref[...] = attn.astype(attn_ref.dtype)
    o = jax.lax.dot_general(attn.astype(v.dtype), v, (((2,), (1,)), ((0,), (0,))),
                            preferred_element_type=jnp.float32)   # (BH, tq, dv) f32

    wfc = wfc_ref[...]                               # (H*dv, dm) bf16
    gamma = g_ref[...]                               # (1, dm) f32
    beta = b_ref[...]                                # (1, dm) f32
    sz_b = res_ref.shape[1]
    for b in range(sz_b):
        acc = None
        for h in range(n_head):
            xh = o[b * n_head + h].astype(compute_dtype)        # (tq, dv)
            wh = wfc[h * d_v:(h + 1) * d_v, :]                  # (dv, dm)
            part = jnp.dot(xh, wh, preferred_element_type=jnp.float32)
            acc = part if acc is None else acc + part
        y = acc + res_ref[:, b, :]                              # (tq, dm) f32
        mean = jnp.mean(y, axis=-1, keepdims=True)
        var = jnp.mean(jnp.square(y - mean), axis=-1, keepdims=True)
        yn = (y - mean) * jax.lax.rsqrt(var + eps)
        o_ref[:, b, :] = (yn * gamma + beta).astype(o_ref.dtype)


def fused_attention_fc_ln(qp, kp, vp, mask, residual, w_fc_t, ln_w, ln_b, *,
                          n_head, tq, return_attn, attn_dtype, out_dtype,
                          eps=1e-6, compute_dtype=jnp.bfloat16):
    bh, lq, dk = qp.shape
    _, lk, dv = vp.shape
    _, sz_b, dm = residual.shape
    has_mask = mask is not None

    in_specs = [pl.BlockSpec((bh, tq, dk), lambda i: (0, i, 0)),
                pl.BlockSpec((bh, lk, dk), lambda i: (0, 0, 0)),
                pl.BlockSpec((bh, lk, dv), lambda i: (0, 0, 0))]
    args = [qp, kp, vp]
    if has_mask:
        mrows = mask.shape[0]
        in_specs.append(pl.BlockSpec((mrows, tq, lk), lambda i: (0, i, 0)))
        args.append(mask)
    in_specs += [pl.BlockSpec((tq, sz_b, dm), lambda i: (i, 0, 0)),        # residual
                 pl.BlockSpec((n_head * dv, dm), lambda i: (0, 0)),        # W_fc
                 pl.BlockSpec((1, dm), lambda i: (0, 0)),                  # LN gamma
                 pl.BlockSpec((1, dm), lambda i: (0, 0))]                  # LN beta
    args += [residual, w_fc_t, ln_w.reshape(1, dm), ln_b.reshape(1, dm)]

    o_shape = jax.ShapeDtypeStruct((lq, sz_b, dm), out_dtype)
    o_spec = pl.BlockSpec((tq, sz_b, dm), lambda i: (i, 0, 0))
    if return_attn:
        out_shape = (o_shape, jax.ShapeDtypeStruct((bh, lq, lk), attn_dtype))
        out_specs = (o_spec, pl.BlockSpec((bh, tq, lk), lambda i: (0, i, 0)))
    else:
        out_shape, out_specs = o_shape, o_spec

    kernel = functools.partial(_attn_fc_ln_kernel, n_head=n_head, d_v=dv, eps=eps,
                               compute_dtype=compute_dtype, has_mask=has_mask,
                               return_attn=return_attn)
    res = pl.pallas_call(
        kernel, out_shape=out_shape, grid=(lq // tq,),
        in_specs=in_specs, out_specs=out_specs,
        compiler_params=_mosaic_params(1),
    )(*args)
    if return_attn:
        return res[0], res[1]
    return res, None


# --------------------------------------------------------------------------
# Kernel 3 (fallback path): bh-tiled scaled-dot-product attention
# --------------------------------------------------------------------------
def _sdpa_kernel(*refs, has_mask, return_attn):
    q_ref, k_ref, v_ref = refs[:3]
    pos = 3
    m_ref = None
    if has_mask:
        m_ref = refs[pos]
        pos += 1
    o_ref = refs[pos]
    attn_ref = refs[pos + 1] if return_attn else None

    q = q_ref[...]
    k = k_ref[...]
    v = v_ref[...]
    s = jax.lax.dot_general(q, k, (((2,), (2,)), ((0,), (0,))),
                            preferred_element_type=jnp.float32)
    if has_mask:
        s = s + m_ref[...]
    s_max = jnp.max(s, axis=-1, keepdims=True)
    p = jnp.exp(s - s_max)
    denom = jnp.sum(p, axis=-1, keepdims=True)
    attn = p * pl.reciprocal(denom)
    if attn_ref is not None:
        attn_ref[...] = attn.astype(attn_ref.dtype)
    o = jax.lax.dot_general(attn.astype(v.dtype), v, (((2,), (1,)), ((0,), (0,))),
                            preferred_element_type=jnp.float32)
    o_ref[...] = o.astype(o_ref.dtype)


def scaled_dot_product_attention(q, k, v, mask, *, return_attn=True,
                                 attn_dtype=jnp.float32):
    bh, lq, dk = q.shape
    _, lk, dv = v.shape
    has_mask = mask is not None
    mask_rows = mask.shape[0] if has_mask else 0
    attn_bytes = np.dtype(attn_dtype).itemsize if return_attn else 0
    bh_t = _pick_bh_tile(bh, lq, lk, dk, dv, attn_bytes, mask_rows)

    in_specs = [pl.BlockSpec((bh_t, lq, dk), lambda b: (b, 0, 0)),
                pl.BlockSpec((bh_t, lk, dk), lambda b: (b, 0, 0)),
                pl.BlockSpec((bh_t, lk, dv), lambda b: (b, 0, 0))]
    args = [q, k, v]
    if has_mask:
        shared = mask_rows == 1
        m_block = (1 if shared else bh_t, lq, lk)
        m_index = (lambda b: (0, 0, 0)) if shared else (lambda b: (b, 0, 0))
        in_specs.append(pl.BlockSpec(m_block, m_index))
        args.append(mask)

    o_spec = pl.BlockSpec((bh_t, lq, dv), lambda b: (b, 0, 0))
    o_shape = jax.ShapeDtypeStruct((bh, lq, dv), q.dtype)
    if return_attn:
        out_shape = (o_shape, jax.ShapeDtypeStruct((bh, lq, lk), attn_dtype))
        out_specs = (o_spec, pl.BlockSpec((bh_t, lq, lk), lambda b: (b, 0, 0)))
    else:
        out_shape, out_specs = o_shape, o_spec

    res = pl.pallas_call(
        functools.partial(_sdpa_kernel, has_mask=has_mask, return_attn=return_attn),
        out_shape=out_shape, grid=(bh // bh_t,),
        in_specs=in_specs, out_specs=out_specs,
        compiler_params=_mosaic_params(1),
    )(*args)
    if return_attn:
        return res[0], res[1]
    return res, None


# --------------------------------------------------------------------------
# Kernel 4 (fallback path): output projection + residual + LayerNorm(eps=1e-6)
# --------------------------------------------------------------------------
def _fc_res_ln_kernel(x_ref, res_ref, w_ref, g_ref, b_ref, o_ref,
                      *, eps, compute_dtype):
    x = x_ref[...].astype(compute_dtype)
    y = jnp.dot(x, w_ref[...], preferred_element_type=jnp.float32)
    y = y + res_ref[...]
    mean = jnp.mean(y, axis=-1, keepdims=True)
    var = jnp.mean(jnp.square(y - mean), axis=-1, keepdims=True)
    yn = (y - mean) * jax.lax.rsqrt(var + eps)
    o_ref[...] = (yn * g_ref[...] + b_ref[...]).astype(o_ref.dtype)


def fc_residual_layernorm(x, residual, w_fc_t, ln_w, ln_b, *, eps=1e-6,
                          compute_dtype=jnp.bfloat16, out_dtype=jnp.float32):
    n, d_in = x.shape
    d_model = w_fc_t.shape[1]
    tn = _row_tile(n, d_in * 2 + d_model * 12)
    return pl.pallas_call(
        functools.partial(_fc_res_ln_kernel, eps=eps, compute_dtype=compute_dtype),
        out_shape=jax.ShapeDtypeStruct((n, d_model), out_dtype),
        grid=(n // tn,),
        in_specs=[pl.BlockSpec((tn, d_in), lambda i: (i, 0)),
                  pl.BlockSpec((tn, d_model), lambda i: (i, 0)),
                  pl.BlockSpec((d_in, d_model), lambda i: (0, 0)),
                  pl.BlockSpec((1, d_model), lambda i: (0, 0)),
                  pl.BlockSpec((1, d_model), lambda i: (0, 0))],
        out_specs=pl.BlockSpec((tn, d_model), lambda i: (i, 0)),
        compiler_params=_mosaic_params(1),
    )(x, residual, w_fc_t, ln_w.reshape(1, d_model), ln_b.reshape(1, d_model))


# --------------------------------------------------------------------------
# Module wrapper (parameter setup + free reshapes in JAX, compute in Pallas)
# --------------------------------------------------------------------------
class MultiHeadAttentionPallas:
    """Forward-equivalent of the sasrec MultiHeadAttention module (eval mode)."""

    def __init__(self, n_head, d_model, d_k, d_v, key,
                 compute_dtype=jnp.bfloat16,
                 attn_dtype=jnp.float32, out_dtype=jnp.float32):
        # the reference's final .view() requires n_head*d_v == d_model
        assert n_head * d_v == d_model
        self.n_head, self.d_model, self.d_k, self.d_v = n_head, d_model, d_k, d_v
        self.compute_dtype = compute_dtype
        self.attn_dtype = attn_dtype        # bf16 halves the attn-prob HBM traffic
        self.out_dtype = out_dtype

        def xavier_uniform(k, shape):
            fan_out, fan_in = shape
            limit = math.sqrt(6.0 / (fan_in + fan_out))
            return jax.random.uniform(k, shape, jnp.float32, -limit, limit)

        k1, k2, k3, k4 = jax.random.split(key, 4)
        # PyTorch weights are (out, in); store pre-transposed (in, out) bf16 so
        # kernels never transpose.  The 1/sqrt(d_k) attention scale is folded
        # into W_q here: (x @ Wq) / sqrt(d_k) == x @ (Wq / sqrt(d_k)).
        scale = 1.0 / math.sqrt(d_k)
        self.wq_t = (xavier_uniform(k1, (n_head * d_k, d_model)).T * scale).astype(compute_dtype)
        self.wk_t = xavier_uniform(k2, (n_head * d_k, d_model)).T.astype(compute_dtype)
        self.wv_t = xavier_uniform(k3, (n_head * d_v, d_model)).T.astype(compute_dtype)
        self.w_fc_t = xavier_uniform(k4, (d_model, n_head * d_v)).T.astype(compute_dtype)
        self.ln_weight = jnp.ones((d_model,), jnp.float32)
        self.ln_bias = jnp.zeros((d_model,), jnp.float32)

    def __call__(self, q, k, v, attn_mask=None, batch_first=False,
                 return_attn=True, use_fused=None):
        n_head, d_k, d_v = self.n_head, self.d_k, self.d_v
        len_q, sz_b, d_model = q.shape            # (tgt_len, bsz, embed_dim)
        len_k, len_v = k.shape[0], v.shape[0]
        residual = q
        cdt = self.compute_dtype

        xq = q.reshape(len_q * sz_b, d_model)

        # --- projections --------------------------------------------------
        if q is k and k is v:
            qp, kp, vp = self_qkv_projection(xq, self.wq_t, self.wk_t, self.wv_t, cdt)
        elif len_q == len_k == len_v:
            xk = k.reshape(len_k * sz_b, d_model)
            xv = v.reshape(len_v * sz_b, d_model)
            qp, kp, vp = qkv_projection(xq, xk, xv,
                                        self.wq_t, self.wk_t, self.wv_t, cdt)
        else:
            xk = k.reshape(len_k * sz_b, d_model)
            xv = v.reshape(len_v * sz_b, d_model)
            qp = linear_nobias(xq, self.wq_t, cdt, cdt)
            kp = linear_nobias(xk, self.wk_t, cdt, cdt)
            vp = linear_nobias(xv, self.wv_t, cdt, cdt)

        # Exactly reproduce torch's contiguous .view() reinterpretation.
        qp = qp.reshape(n_head * sz_b, len_q, d_k)
        kp = kp.reshape(n_head * sz_b, len_k, d_k)
        vp = vp.reshape(n_head * sz_b, len_v, d_v)

        # --- additive mask (None -> no mask operand at all) ----------------
        bh = n_head * sz_b
        mask = None
        if attn_mask is not None:
            if attn_mask.ndim == 2:
                if attn_mask.shape != (len_q, len_k):
                    raise RuntimeError("bad 2D attn_mask shape")
                mask = attn_mask.astype(jnp.float32).reshape(1, len_q, len_k)
            elif attn_mask.ndim == 3:
                if attn_mask.shape != (bh, len_q, len_k):
                    raise RuntimeError("bad 3D attn_mask shape")
                mask = attn_mask.astype(jnp.float32)
            else:
                raise RuntimeError("attn_mask dimension not supported")

        mask_rows = mask.shape[0] if mask is not None else 0
        attn_bytes = np.dtype(self.attn_dtype).itemsize if return_attn else 0
        out_bytes = np.dtype(self.out_dtype).itemsize

        tq = None
        if use_fused is not False:
            tq = _pick_fused_tq(bh, len_q, len_k, d_k, d_v, sz_b, d_model, n_head,
                                mask_rows, attn_bytes, out_bytes)

        q_out = attn = None
        if tq is not None:
            try:
                q_out, attn = fused_attention_fc_ln(
                    qp, kp, vp, mask, residual, self.w_fc_t,
                    self.ln_weight, self.ln_bias,
                    n_head=n_head, tq=tq, return_attn=return_attn,
                    attn_dtype=self.attn_dtype, out_dtype=self.out_dtype,
                    eps=1e-6, compute_dtype=cdt)
            except Exception:
                # Compatibility guard: if this jax/Mosaic build rejects the fused
                # kernel, transparently use the two-kernel fallback below.
                q_out = attn = None

        if q_out is None:
            out, attn = scaled_dot_product_attention(
                qp, kp, vp, mask, return_attn=return_attn,
                attn_dtype=self.attn_dtype)
            # Reference's transpose(0,1).contiguous().view(tgt_len, bsz, embed);
            # the head/batch interleave cannot be a rectangular BlockSpec, so it
            # stays a single XLA pass on the bf16 tensor in this fallback path.
            x_fc = jnp.transpose(out, (1, 0, 2)).reshape(len_q * sz_b, n_head * d_v)
            y = fc_residual_layernorm(
                x_fc, residual.reshape(len_q * sz_b, d_model),
                self.w_fc_t, self.ln_weight, self.ln_bias,
                eps=1e-6, compute_dtype=cdt, out_dtype=self.out_dtype)
            q_out = y.reshape(len_q, sz_b, d_model)

        if batch_first:
            q_out = jnp.transpose(q_out, (1, 0, 2))
        return q_out, attn


if __name__ == "__main__":
    n_head, d_model, d_k, d_v = 4, 32, 8, 8
    seq, batch = 8, 2

    key = jax.random.PRNGKey(0)
    k_params, k_q, k_k, k_v = jax.random.split(key, 4)

    mha = MultiHeadAttentionPallas(n_head, d_model, d_k, d_v, k_params)

    q = jax.random.normal(k_q, (seq, batch, d_model), jnp.float32)
    k = jax.random.normal(k_k, (seq, batch, d_model), jnp.float32)
    v = jax.random.normal(k_v, (seq, batch, d_model), jnp.float32)

    # 2D additive causal mask (tgt_len, src_len) with finite large negatives
    causal = jnp.where(jnp.triu(jnp.ones((seq, seq), dtype=bool), k=1),
                       -1e9, 0.0).astype(jnp.float32)

    # 1) self-attention: fused attention + fc + residual + LayerNorm path
    out1, attn1 = mha(q, q, q, attn_mask=causal, batch_first=False)
    jax.block_until_ready((out1, attn1))
    assert out1.shape == (seq, batch, d_model)
    assert attn1.shape == (n_head * batch, seq, seq)

    # 2) cross-attention projections + forced two-kernel fallback path
    out2, attn2 = mha(q, k, v, attn_mask=causal, use_fused=False)
    jax.block_until_ready((out2, attn2))
    assert out2.shape == (seq, batch, d_model)
    assert attn2.shape == (n_head * batch, seq, seq)

    # 3) fused path, no mask operand, attention probabilities not materialized
    out3, attn3 = mha(q, q, q, attn_mask=None, return_attn=False)
    jax.block_until_ready(out3)
    assert out3.shape == (seq, batch, d_model)
    assert attn3 is None

    # 4) different source length: column-tiled separate linears + fused attention
    k2 = jax.random.normal(jax.random.PRNGKey(7), (2 * seq, batch, d_model), jnp.float32)
    out4, attn4 = mha(q, k2, k2, attn_mask=None)
    jax.block_until_ready((out4, attn4))
    assert out4.shape == (seq, batch, d_model)
    assert attn4.shape == (n_head * batch, seq, 2 * seq)

    # consistency: fused vs fallback attention paths agree at bf16 level
    out1b, _ = mha(q, q, q, attn_mask=causal, use_fused=False)
    jax.block_until_ready(out1b)
    assert jnp.allclose(out1, out1b, atol=2e-2, rtol=2e-2)

    print("KERNEL_OK")
</pallas_src>

<mosaic_0001>
module attributes {stable_mosaic.version = 11 : i64} {
  func.func @_self_qkv_kernel(%arg0: i32, %arg1: memref<8x32xf32, #tpu.memory_space<vmem>>, %arg2: memref<32x32xbf16, #tpu.memory_space<vmem>>, %arg3: memref<32x32xbf16, #tpu.memory_space<vmem>>, %arg4: memref<32x32xbf16, #tpu.memory_space<vmem>>, %arg5: memref<8x32xbf16, #tpu.memory_space<vmem>>, %arg6: memref<8x32xbf16, #tpu.memory_space<vmem>>, %arg7: memref<8x32xbf16, #tpu.memory_space<vmem>>) attributes {dimension_semantics = [#tpu.dimension_semantics<parallel>], iteration_bounds = array<i64: 2>, scalar_prefetch = 0 : i64, scratch_operands = 0 : i64, tpu.core_type = #tpu.core_type<tc>, window_params = [{transform_indices = @transform_0, window_bounds = array<i64: 8, 32>}, {pipeline_mode = #tpu.pipeline_mode<synchronous>, transform_indices = @transform_1, window_bounds = array<i64: 32, 32>}, {pipeline_mode = #tpu.pipeline_mode<synchronous>, transform_indices = @transform_2, window_bounds = array<i64: 32, 32>}, {pipeline_mode = #tpu.pipeline_mode<synchronous>, transform_indices = @transform_3, window_bounds = array<i64: 32, 32>}, {transform_indices = @transform_4, window_bounds = array<i64: 8, 32>}, {transform_indices = @transform_5, window_bounds = array<i64: 8, 32>}, {transform_indices = @transform_6, window_bounds = array<i64: 8, 32>}]} {
    %c0 = arith.constant 0 : index
    %c0_0 = arith.constant 0 : index
    %0 = vector.load %arg1[%c0, %c0_0] : memref<8x32xf32, #tpu.memory_space<vmem>>, vector<8x32xf32>
    %1 = arith.truncf %0 : vector<8x32xf32> to vector<8x32xbf16>
    %c0_1 = arith.constant 0 : index
    %c0_2 = arith.constant 0 : index
    %2 = vector.load %arg2[%c0_1, %c0_2] : memref<32x32xbf16, #tpu.memory_space<vmem>>, vector<32x32xbf16>
    %cst = arith.constant dense<0.000000e+00> : vector<8x32xf32>
    %3 = tpu.matmul %1, %2, %cst {dimension_numbers = #tpu.dot_dimension_numbers<[1], [0], [0], [1], [0, 0, 1, 1], [], []>} : vector<8x32xbf16>, vector<32x32xbf16>, vector<8x32xf32> -> vector<8x32xf32>
    %4 = arith.truncf %3 : vector<8x32xf32> to vector<8x32xbf16>
    %c0_3 = arith.constant 0 : index
    %c0_4 = arith.constant 0 : index
    %5 = vector.load %arg5[%c0_3, %c0_4] : memref<8x32xbf16, #tpu.memory_space<vmem>>, vector<8x32xbf16>
    tpu.vector_store %arg5[%c0_3, %c0_4], %4 {strides = array<i32>} : memref<8x32xbf16, #tpu.memory_space<vmem>>, vector<8x32xbf16>,
    %c0_5 = arith.constant 0 : index
    %c0_6 = arith.constant 0 : index
    %6 = vector.load %arg3[%c0_5, %c0_6] : memref<32x32xbf16, #tpu.memory_space<vmem>>, vector<32x32xbf16>
    %cst_7 = arith.constant dense<0.000000e+00> : vector<8x32xf32>
    %7 = tpu.matmul %1, %6, %cst_7 {dimension_numbers = #tpu.dot_dimension_numbers<[1], [0], [0], [1], [0, 0, 1, 1], [], []>} : vector<8x32xbf16>, vector<32x32xbf16>, vector<8x32xf32> -> vector<8x32xf32>
    %8 = arith.truncf %7 : vector<8x32xf32> to vector<8x32xbf16>
    %c0_8 = arith.constant 0 : index
    %c0_9 = arith.constant 0 : index
    %9 = vector.load %arg6[%c0_8, %c0_9] : memref<8x32xbf16, #tpu.memory_space<vmem>>, vector<8x32xbf16>
    tpu.vector_store %arg6[%c0_8, %c0_9], %8 {strides = array<i32>} : memref<8x32xbf16, #tpu.memory_space<vmem>>, vector<8x32xbf16>,
    %c0_10 = arith.constant 0 : index
    %c0_11 = arith.constant 0 : index
    %10 = vector.load %arg4[%c0_10, %c0_11] : memref<32x32xbf16, #tpu.memory_space<vmem>>, vector<32x32xbf16>
    %cst_12 = arith.constant dense<0.000000e+00> : vector<8x32xf32>
    %11 = tpu.matmul %1, %10, %cst_12 {dimension_numbers = #tpu.dot_dimension_numbers<[1], [0], [0], [1], [0, 0, 1, 1], [], []>} : vector<8x32xbf16>, vector<32x32xbf16>, vector<8x32xf32> -> vector<8x32xf32>
    %12 = arith.truncf %11 : vector<8x32xf32> to vector<8x32xbf16>
    %c0_13 = arith.constant 0 : index
    %c0_14 = arith.constant 0 : index
    %13 = vector.load %arg7[%c0_13, %c0_14] : memref<8x32xbf16, #tpu.memory_space<vmem>>, vector<8x32xbf16>
    tpu.vector_store %arg7[%c0_13, %c0_14], %12 {strides = array<i32>} : memref<8x32xbf16, #tpu.memory_space<vmem>>, vector<8x32xbf16>,
    return
  }
  func.func @transform_0(%arg0: i32) -> (i32, i32) {
    %c0_i32 = arith.constant 0 : i32
    %c0_i32_0 = arith.constant 0 : i32
    return %arg0, %c0_i32 : i32, i32
  }
  func.func @transform_1(%arg0: i32) -> (i32, i32) {
    %c0_i32 = arith.constant 0 : i32
    %c0_i32_0 = arith.constant 0 : i32
    %c0_i32_1 = arith.constant 0 : i32
    return %c0_i32, %c0_i32_0 : i32, i32
  }
  func.func @transform_2(%arg0: i32) -> (i32, i32) {
    %c0_i32 = arith.constant 0 : i32
    %c0_i32_0 = arith.constant 0 : i32
    %c0_i32_1 = arith.constant 0 : i32
    return %c0_i32, %c0_i32_0 : i32, i32
  }
  func.func @transform_3(%arg0: i32) -> (i32, i32) {
    %c0_i32 = arith.constant 0 : i32
    %c0_i32_0 = arith.constant 0 : i32
    %c0_i32_1 = arith.constant 0 : i32
    return %c0_i32, %c0_i32_0 : i32, i32
  }
  func.func @transform_4(%arg0: i32) -> (i32, i32) {
    %c0_i32 = arith.constant 0 : i32
    %c0_i32_0 = arith.constant 0 : i32
    return %arg0, %c0_i32 : i32, i32
  }
  func.func @transform_5(%arg0: i32) -> (i32, i32) {
    %c0_i32 = arith.constant 0 : i32
    %c0_i32_0 = arith.constant 0 : i32
    return %arg0, %c0_i32 : i32, i32
  }
  func.func @transform_6(%arg0: i32) -> (i32, i32) {
    %c0_i32 = arith.constant 0 : i32
    %c0_i32_0 = arith.constant 0 : i32
    return %arg0, %c0_i32 : i32, i32
  }
}

</mosaic_0001>

<bundles_post_ra>
// kernel: tpu_custom_call.1
= control target key start
LH: loop header
LB: loop body
LE: loop exit
PB: predicated region body
PF: predicated region fallthrough
CT: control target
= control target key end

     0   :  { %s1330_s0 = inlined_call_operand.hbm [shape: f32[16,32], index: 0, kind: input, shape index: {}]   ;;  %s1331_s1 = inlined_call_operand.hbm [shape: bf16[32,32], index: 1, kind: input, shape index: {}]   ;;  %s1332_s2 = inlined_call_operand.hbm [shape: bf16[32,32], index: 2, kind: input, shape index: {}]   ;;  %s1333_s3 = inlined_call_operand.hbm [shape: bf16[32,32], index: 3, kind: input, shape index: {}]   ;;  %s1334_s4 = inlined_call_operand.hbm [shape: bf16[16,32], index: 4, kind: output, shape index: {0}]   ;;  %s1335_s5 = inlined_call_operand.hbm [shape: bf16[16,32], index: 5, kind: output, shape index: {1}]   ;;  %s1336_s6 = inlined_call_operand.hbm [shape: bf16[16,32], index: 6, kind: output, shape index: {2}]  }
   0x1   :  { %1342 = sst [smem:[#allocation21_spill]] %s1330_s0 }
   0x2   :  { %12 = vsyncpa [#allocation3], 0 }
   0x3   :  { %14 = vsyncpa [#allocation3 + $0x1], 0 }
   0x4   :  { %15 = vsyncpa [#allocation6], 0 }
   0x5   :  { %16 = vsyncpa [#allocation9], 0 }
   0x6   :  { %17 = vsyncpa [#allocation4], 0 }
   0x7   :  { %19 = vsyncpa [#allocation4 + $0x1], 0 }
   0x8   :  { %20 = vsyncpa [#allocation12], 0 }
   0x9   :  { %22 = vsyncpa [#allocation12 + $0x1], 0  ;;  %s1096_s21 = smov 0   ;;  %s1098_s22 = smov 0  }
   0xa   :  { %s1100_s23 = smov 0   ;;  %s1102_s24 = smov 0  }
   0xb LB: > { %s211_s27 = sshll.u32 %s1331_s1, 4  ;;  %s1120_s28 = sadd.s32 4294967295, %s1054_s24   ;;  %s1054_s24 = sphi %s1102_s24, %s1363_s24   ;;  %s1050_s23 = sphi %s1100_s23, %s1362_s23   ;;  %s1046_s22 = sphi %s1098_s22, %s1361_s22   ;;  %s1042_s21 = sphi %s1096_s21, %s1360_s21   ;;  %s212_s27 = int_to_ptr.hbm [resolvable:$true] %s211_s27 }
   0xc   : > { %p655_p0 = scmp.ge.s32.totalorder %s1054_s24, 1  ;;  %p49_p1 = scmp.eq.s32.totalorder %s1120_s28, 0 }
   0xd   : > { %p200_p2 = scmp.lt.s32.totalorder %s1054_s24, 3  ;;  %s1056_s30 = smov [#allocation5]  }
   0xe   : > { %s213_s7 = sshll.u32 %s1056_s30, 4  ;;  %s225_s10 = sshll.u32 %s1332_s2, 4  ;;  %s214_s7 = int_to_ptr.vmem [resolvable:$true] %s213_s7  ;;  %s226_s10 = int_to_ptr.hbm [resolvable:$true] %s225_s10 }
   0xf   : > { %p1125_p3 = pnand %p655_p0, %p200_p2  ;;  %s239_s14 = sshll.u32 %s1333_s3, 4  ;;  %s240_s14 = int_to_ptr.hbm [resolvable:$true] %s239_s14 }
  0x10   : > { %s1057_s15 = smov [#allocation7]   ;;  %s1058_s17 = smov 64  }
  0x11   : > { %p731_p4 = pneg %p1125_p3  ;;  %s227_s16 = sshll.u32 %s1057_s15, 4  ;;  %s228_s16 = int_to_ptr.vmem [resolvable:$true] %s227_s16 }
  0x12   : > { %s1059_s18 = smov 4   ;;  %s1060_s19 = smov [#allocation8]  }
  0x13   : > { %p1137_p6 = pnand %p731_p4, %p49_p1  ;;  %s241_s20 = sshll.u32 %s1060_s19, 4  ;;  %s242_s20 = int_to_ptr.vmem [resolvable:$true] %s241_s20 }
  0x14   : > { %s1337_s25 = sadd.s32 4294967294, %s1054_s24   ;;  %s1152_s26 = sadd.s32 1, %s1054_s24  }
  0x15   : > { %734 = dma.hbm_to_vmem [thread:$0]  (!%p1137_p6), %s212_s27, 256, %s214_s7, [#allocation6], %s1058_s17, %s1058_s17, %s1059_s18  }
  0x16   : > { %737 = dma.hbm_to_vmem [thread:$0]  (!%p1137_p6), %s226_s10, 256, %s228_s16, [#allocation6], %s1058_s17, %s1058_s17, %s1059_s18  }
  0x17   : > { %740 = dma.hbm_to_vmem [thread:$0]  (!%p1137_p6), %s240_s14, 256, %s242_s20, [#allocation9], %s1058_s17, %s1058_s17, %s1059_s18  }
  0x18   : > { %s35_s27 = sadd.s32 1, %s1050_s23  ;;  %s32_s30 = ssub.s32 %s1054_s24, %s1152_s26 }
  0x19   : > { %p42_p7 = scmp.ne.s32.totalorder %s1050_s23, %s1046_s22  ;;  %p33_p8 = scmp.eq.s32.totalorder %s32_s30, 0 }
  0x1a   : > { %p43_p9 = scmp.eq.s32.totalorder %s1054_s24, 0  ;;  %p48_p10 = scmp.ne.s32.totalorder %s1046_s22, %s1042_s21 }
  0x1b   : > { %p135_p11 = scmp.eq.s32.totalorder %s1120_s28, 1  ;;  %p141_p0 = scmp.eq.s32.totalorder %s1337_s25, 1 }
  0x1c   : > { %s1164_s7 = scalar_select %p33_p8, %s1050_s23, %s35_s27  }
  0x1d   : > { %p1168_p12 = por %p49_p1, %p48_p10  ;;  %p1172_p13 = por %p135_p11, %p42_p7 }
  0x1e   : > { %p44_p2 = por %p43_p9, %p42_p7  ;;  %s255_s10 = sand.u32 1, %s1050_s23  }
  0x1f   : > { %p1179_p4 = por %p141_p0, %p48_p10  ;;  %p758_p6 = scmp.lt.s32.totalorder %s1054_s24, 2 }
  0x20   : > { %s660_s12 = sshll.u32 %s255_s10, 3  ;;  %s661_s13 = sshll.u32 %s1054_s24, 3 }
  0x21   : > { %s1348_s0 = sld [smem:[#allocation21_spill]]  ;;  %s259_s18 = scalar_lea.vmem [#allocation2], %s660_s12 }
  0x22   : > { %s267_s19 = sshll.u32 %s259_s18, 4  ;;  %p1188_p8 = pnand %p758_p6, %p44_p2  ;;  %s268_s19 = int_to_ptr.vmem [resolvable:$true] %s267_s19 }
  0x23   : > { %s256_s27 = scalar_lea.sflag [#allocation3], %s255_s10 }
  0x24   : > { %p894_p9 = pneg %p1188_p8 }
  0x27   : > { %s263_s16 = scalar_lea.hbm %s1348_s0, %s661_s13  ;;  %s897_s12 = scalar_lea.hbm %s1348_s0, 16 }
  0x28   : > { %s265_s17 = sshll.u32 %s263_s16, 4  ;;  %s266_s17 = int_to_ptr.hbm [resolvable:$true] %s265_s17 }
  0x29   : > { %s890_s30 = sshra.s32 %s266_s17, 4  ;;  %s891_s30 = int_to_ptr.hbm [resolvable:$true] %s890_s30 }
  0x2a   : > { %s892_s25 = scalar_lea.hbm %s891_s30, 8  ;;  %p898_p0 = scmp.lt.s32.totalorder %s891_s30, %s1348_s0 }
  0x2b   : > { %p893_p7 = scmp.ne.s32.totalorder %s891_s30, %s892_s25  ;;  %p899_p2 = scmp.lt.s32.totalorder %s897_s12, %s892_s25 }
  0x2d   : > { %p895_p10 = pnand %p894_p9, %p893_p7  ;;  %p900_p6 = por %p899_p2, %p898_p0 }
  0x2f   : > { %p896_p11 = pneg %p895_p10 }
  0x31   : > { %p901_p5 = pnand %p900_p6, %p896_p11 }
  0x33   : > { %904 = shalt.err (!%p901_p5)
}
  0x34   : > { %744 = dma.hbm_to_vmem [thread:$0]  (!%p1188_p8), %s266_s17, 128, %s268_s19, %s256_s27  }
  0x35   : > { %276 = sbr.rel (%p1125_p3) target bundleno = 234 (0xea), region = 36 }
  0x3a   : > { %s1205_s10 = sand.u32 1, %s1046_s22  }
  0x3b   : > { %s663_s18 = sshll.u32 %s1205_s10, 3  ;;  %s279_s13 = scalar_lea.sflag [#allocation3], %s1205_s10 }
  0x3c   : > { %s282_s14 = scalar_lea.vmem [#allocation2], %s663_s18 }
  0x3d   : > { %1021 = dma.done.wait (%p1168_p12), %s279_s13, 128  }
  0x3e   : > { %1023 = vsyncadd (%p1168_p12), %s279_s13, 4294967168 }
  0x3f   : > { %1025 = dma.done.wait (%p49_p1), [#allocation6], 512  }
  0x40   : > { %1027 = vsyncadd (%p49_p1), [#allocation6], 4294966784 }
  0x41   : > { %1029 = dma.done.wait (%p49_p1), [#allocation9], 256  }
  0x42   : > { %1031 = vsyncadd (%p49_p1), [#allocation9], 4294967040  ;;  %v706_v0 = vld [vmem:[#allocation5 + $0x8] sm:$0xff]  ;;  %v708_v1 = vld [vmem:[#allocation7 + $0x8] sm:$0xff]  ;;  %vm356_vm0 = vcmask 261120   ;;  %s700_s29 = sshll.u32 %s1120_s28, 2 }
  0x43   : > { %v710_v2 = vld [vmem:[#allocation8 + $0x8] sm:$0xff]  ;;  %366 = vmatpush.bf16.msra.mxu0 %v706_v0  ;;  %398 = vmatpush.bf16.msra.mxu1 %v708_v1  ;;  %v705_v3 = vld [vmem:[#allocation5] sm:$0xff]  ;;  %v707_v4 = vld [vmem:[#allocation7] sm:$0xff]  ;;  %s1223_s25 = sshll.u32 %s1205_s10, 2  ;;  %s473_s19 = scalar_lea.hbm %s1335_s5, %s700_s29  ;;  %vm374_vm1 = vcmask 257024  }
  0x44   : > { %v338_v5 = vld [vmem:[%s282_s14] sm:$0xff]  ;;  %429 = vmatpush.bf16.msra.mxu2 %v710_v2  ;;  %v709_v6 = vld [vmem:[#allocation8] sm:$0xff]  ;;  %s443_s20 = sand.u32 1, %s1120_s28   ;;  %s329_s27 = scalar_lea.vmem [#allocation11], %s1223_s25 }
  0x45   : > { %v339_v7 = vpack.c.bf16 %v338_v5, %v338_v5  ;;  %s1230_s30 = sshll.u32 %s329_s27, 4  ;;  %s459_s16 = scalar_lea.hbm %s1334_s4, %s700_s29 }
  0x46   : > { %1350 = sst [smem:[#allocation19_spill]] %s1230_s30  ;;  %s1235_s18 = sshll.u32 %s473_s19, 4  ;;  %s478_s18 = int_to_ptr.hbm [resolvable:$true] %s1235_s18 }
  0x47   : > { %367 = vmatpush.bf16.msra.mxu0 %v705_v3  ;;  %399 = vmatpush.bf16.msra.mxu1 %v707_v4  ;;  %s1338_s13 = scalar_lea.vmem [#allocation10], %s1223_s25  ;;  %s1243_s28 = sshll.u32 %s459_s16, 4  ;;  %s464_s28 = int_to_ptr.hbm [resolvable:$true] %s1243_s28 }
  0x48   : > { %430 = vmatpush.bf16.msra.mxu2 %v709_v6  ;;  %s1240_s14 = sshll.u32 %s1338_s13, 4  ;;  %s487_s19 = scalar_lea.hbm %s1336_s6, %s700_s29 }
  0x49   : > { %1351 = sst [smem:[#allocation20_spill]] %s1240_s14  ;;  %s1341_s12 = scalar_lea.vmem [#allocation13], %s1223_s25 }
  0x4a   : > { %678 = vmatmul.msk.bf16.vlgmr.msra.gmra.mxu0 %vm356_vm0, %v339_v7  ;;  %687 = vmatmul.msk.bf16.vlgmr.msra.gmra.mxu1 %vm356_vm0, %v339_v7  ;;  %s1255_s15 = sshll.u32 %s1341_s12, 4  ;;  %s1257_s16 = sshll.u32 %s487_s19, 4  ;;  %s490_s15 = int_to_ptr.vmem [resolvable:$true] %s1255_s15  ;;  %s492_s16 = int_to_ptr.hbm [resolvable:$true] %s1257_s16 }
  0x4b   : > { %696 = vmatmul.msk.bf16.vlgmr.msra.gmra.mxu2 %vm356_vm0, %v339_v7  ;;  %s1259_s13 = scalar_lea.sflag [#allocation12], %s443_s20  ;;  %s934_s30 = sshra.s32 %s478_s18, 4  ;;  %s935_s30 = int_to_ptr.hbm [resolvable:$true] %s934_s30 }
  0x4c   : > { %s936_s0 = scalar_lea.hbm %s935_s30, 4  ;;  %s940_s17 = scalar_lea.hbm %s1335_s5, 8 }
  0x4d   : > { %p937_p1 = scmp.ne.s32.totalorder %s935_s30, %s936_s0  ;;  %p941_p12 = scmp.lt.s32.totalorder %s935_s30, %s1335_s5 }
  0x4e   : > { %p942_p8 = scmp.lt.s32.totalorder %s940_s17, %s936_s0 }
  0x4f   : > { %p938_p3 = pnand %p937_p1, %p1172_p13 }
  0x50   : > { %p943_p7 = por %p942_p8, %p941_p12 }
  0x51   : > { %p939_p5 = pneg %p938_p3 }
  0x53   : > { %p944_p9 = pnand %p943_p7, %p939_p5 }
  0xc7   : > { %v369_v8 = vpop.f32.mrf.mxu0  ;;  %v401_v9 = vpop.f32.mrf.mxu1 }
  0xc8   : > { %v373_v10 = vpack.c.bf16 %v369_v8, %v369_v8  ;;  %v405_v11 = vpack.c.bf16 %v401_v9, %v401_v9 }
  0xca   : > { %406 = vst.msk [vmem:[%s329_s27] sm:$0xf] %vm374_vm1, %v405_v11 }
  0xcb   : > { %947 = shalt.err (!%p944_p9)
}
  0xcc   : > { %s1352_s20 = sld [smem:[#allocation19_spill]]  ;;  %s1354_s29 = scalar_lea.vmem [#allocation10], %s1223_s25 }
  0xcd   : > { %375 = vst.msk [vmem:[%s1354_s29] sm:$0xf] %vm374_vm1, %v373_v10  ;;  %s439_s8 = scalar_lea.sflag [#allocation4], %s1205_s10  ;;  %s962_s30 = sshra.s32 %s464_s28, 4  ;;  %s963_s30 = int_to_ptr.hbm [resolvable:$true] %s962_s30 }
  0xce   : > { %s964_s0 = scalar_lea.hbm %s963_s30, 4  ;;  %s968_s27 = scalar_lea.hbm %s1334_s4, 8 }
  0xcf   : > { %p965_p10 = scmp.ne.s32.totalorder %s963_s30, %s964_s0  ;;  %p969_p2 = scmp.lt.s32.totalorder %s963_s30, %s1334_s4 }
  0xd0   : > { %p970_p6 = scmp.lt.s32.totalorder %s968_s27, %s964_s0 }
  0xd1   : > { %p966_p11 = pnand %p965_p10, %p1172_p13 }
  0xd2   : > { %s1353_s19 = int_to_ptr.vmem [resolvable:$true] %s1352_s20  ;;  %p971_p1 = por %p970_p6, %p969_p2 }
  0xd3   : > { %726 = dma.vmem_to_hbm [thread:$0]  (%p1172_p13), %s1353_s19, 64, %s478_s18, %s1259_s13  }
  0xd4   : > { %p967_p0 = pneg %p966_p11 }
  0xd6   : > { %p972_p3 = pnand %p971_p1, %p967_p0 }
  0xd8   : > { %975 = shalt.err (!%p972_p3)
}
  0xd9   : > { %s1355_s10 = sld [smem:[#allocation20_spill]]  ;;  %v432_v12 = vpop.f32.mrf.mxu2  ;;  %v371_v14 = vpop.f32.mrf.mxu0  ;;  %s1357_s12 = scalar_lea.vmem [#allocation13], %s1223_s25 }
  0xda   : > { %v436_v13 = vpack.c.bf16 %v432_v12, %v432_v12  ;;  %v403_v15 = vpop.f32.mrf.mxu1  ;;  %s990_s19 = sshra.s32 %s492_s16, 4  ;;  %s991_s19 = int_to_ptr.hbm [resolvable:$true] %s990_s19 }
  0xdb   : > { %s992_s29 = scalar_lea.hbm %s991_s19, 4  ;;  %p997_p7 = scmp.lt.s32.totalorder %s991_s19, %s1336_s6 }
  0xdc   : > { %437 = vst.msk [vmem:[%s1357_s12] sm:$0xf] %vm374_vm1, %v436_v13  ;;  %p993_p5 = scmp.ne.s32.totalorder %s991_s19, %s992_s29 }
  0xde   : > { %p994_p12 = pnand %p993_p5, %p1172_p13 }
  0xdf   : > { %s1356_s18 = int_to_ptr.vmem [resolvable:$true] %s1355_s10 }
  0xe0   : > { %725 = dma.vmem_to_hbm [thread:$0]  (%p1172_p13), %s1356_s18, 64, %s464_s28, %s439_s8  }
  0xe1   : > { %p995_p8 = pneg %p994_p12  ;;  %s996_s28 = scalar_lea.hbm %s1336_s6, 8 }
  0xe2   : > { %p998_p9 = scmp.lt.s32.totalorder %s996_s28, %s992_s29 }
  0xe4   : > { %p999_p10 = por %p998_p9, %p997_p7 }
  0xe6   : > { %p1000_p11 = pnand %p999_p10, %p995_p8 }
  0xe8   : > { %1003 = shalt.err (!%p1000_p11)
}
  0xe9   : > { %727 = dma.vmem_to_hbm [thread:$0]  (%p1172_p13), %s490_s15, 64, %s492_s16, %s1259_s13   ;;  %v434_v16 = vpop.f32.mrf.mxu2 }
  0xea PF: > { %s503_s25 = sand.u32 1, %s1042_s21   ;;  %p1358_p0 = scmp.ge.s32.totalorder %s1054_s24, 2 }
  0xeb   : > { %s504_s17 = scalar_lea.sflag [#allocation4], %s503_s25 }
  0xec   : > { %p746_p2 = pnand %p1358_p0, %p1179_p4 }
  0xee   : > { %p747_p6 = pneg %p746_p2 }
  0xf0   : > { %1033 = dma.done.wait (%p747_p6), %s504_s17, 64  }
  0xf1   : > { %1035 = vsyncadd (%p747_p6), %s504_s17, 4294967232  ;;  %s1359_s27 = sadd.s32 4294967294, %s1054_s24  }
  0xf2   : > { %s513_s20 = sand.u32 1, %s1359_s27  }
  0xf3   : > { %s514_s10 = scalar_lea.sflag [#allocation12], %s513_s20 }
  0xf4   : > { %1037 = dma.done.wait (%p747_p6), %s514_s10, 128  }
  0xf5   : > { %1039 = vsyncadd (%p747_p6), %s514_s10, 4294967168  ;;  %p25_p13 = scmp.ge.s32.totalorder %s1152_s26, 4   ;;  %s1360_s21 = smov %s1046_s22 }
  0xf6   : > { %s1361_s22 = smov %s1050_s23  ;;  %s1362_s23 = smov %s1164_s7 }
  0xf7   : > { %s1363_s24 = smov %s1152_s26  ;;  %27 = sbr.rel (!%p25_p13) target bundleno = 11 (0xb), region = 125 }
  0xfc   :  { %530 = vsyncpa [#allocation3], 1 }
  0xfd   :  { %532 = vsyncpa [#allocation3 + $0x1], 1 }
  0xfe   :  { %533 = vsyncpa [#allocation6], 1 }
  0xff   :  { %534 = vsyncpa [#allocation9], 1 }
 0x100   :  { %535 = vsyncpa [#allocation4], 1 }
 0x101   :  { %537 = vsyncpa [#allocation4 + $0x1], 1 }
 0x102   :  { %538 = vsyncpa [#allocation12], 1 }
 0x103   :  { %540 = vsyncpa [#allocation12 + $0x1], 1 }

</bundles_post_ra>
